<compile_context>
chip_gen: v5e
topology: v5e:2x2
jax: 0.10.0
libtpu: 0.0.40
codegen_flags: <defaults>
</compile_context>

<pallas_src>
import jax
import jax.numpy as jnp
from jax.experimental import pallas as pl
from jax.experimental.pallas import tpu as pltpu


# ---------------------------------------------------------------------------
# Hardware queries / capability probes
# ---------------------------------------------------------------------------

def _vmem_capacity_bytes():
    """Physical VMEM per TensorCore; conservative (v7x = 64 MiB) fallback."""
    try:
        cap = getattr(pltpu.get_tpu_info(), "vmem_capacity_bytes", None)
        if cap:
            return int(cap)
    except Exception:  # hardware probe only; never changes kernel semantics
        pass
    return 64 * 1024 * 1024


def _single_buffer_supported():
    """Explicit capability check for pl.Buffered(1) on a BlockSpec."""
    if not hasattr(pl, "Buffered"):
        return False
    try:
        pl.BlockSpec((8, 128), lambda j, bi, k: (0, 0),
                     pipeline_mode=pl.Buffered(1))
    except (TypeError, ValueError):
        return False
    return True


# ---------------------------------------------------------------------------
# Kernel
# ---------------------------------------------------------------------------

def _make_kernel(nk, exact_sigmoid):
    def _epilogue(hf, bf_ref, o_ref):
        tn = o_ref.shape[-1]
        hf = hf + bf_ref[...]                       # f32 bias add
        h1 = hf[:, :tn]                             # l1 tile
        h2 = hf[:, tn:]                             # l2 tile
        denom = 1.0 + jnp.exp(-h2)                  # exp -> EUP
        if exact_sigmoid:
            gate = 1.0 / denom                      # exact for f32 outputs
        else:
            gate = pl.reciprocal(denom, approx=True)  # EUP vrcp
        o_ref[...] = (gate * h1).astype(o_ref.dtype)

    if nk == 1:
        def kernel(x_ref, wf_ref, bf_ref, o_ref):
            hf = jnp.dot(x_ref[...], wf_ref[...],
                         preferred_element_type=jnp.float32)
            _epilogue(hf, bf_ref, o_ref)
    else:
        def kernel(x_ref, wf_ref, bf_ref, o_ref, acc_ref):
            k = pl.program_id(2)

            @pl.when(k == 0)
            def _():
                acc_ref[...] = jnp.zeros_like(acc_ref)

            acc_ref[...] += jnp.dot(x_ref[...], wf_ref[...],
                                    preferred_element_type=jnp.float32)

            @pl.when(k == nk - 1)
            def _():
                _epilogue(acc_ref[...], bf_ref, o_ref)

    return kernel


# ---------------------------------------------------------------------------
# Tile planning (generation-aware)
# ---------------------------------------------------------------------------

def _vmem_estimate(tile_b, tile_k, tile_n, nk, itemsize, out_itemsize, w_bufs):
    x_bytes = 2 * tile_b * tile_k * itemsize               # double-buffered x
    w_bytes = w_bufs * tile_k * 2 * tile_n * itemsize      # fused weights
    b_bytes = w_bufs * 2 * tile_n * 4                      # fused bias (f32)
    o_bytes = 2 * tile_b * tile_n * out_itemsize           # output
    acc_bytes = tile_b * 2 * tile_n * 4 if nk > 1 else 0   # f32 accumulator
    tmp_bytes = 3 * tile_b * tile_n * 4                    # hf/h2/gate temps
    return x_bytes + w_bytes + b_bytes + o_bytes + acc_bytes + tmp_bytes


def _plan_weight_tiles(IN, OUT, itemsize, vmem_cap):
    # Per-buffer fused-weight budget: 16 MiB on 128 MiB parts (v5e/v6e),
    # ~10 MiB on v7x's 64 MiB.
    w_budget = min(16 * 1024 * 1024, vmem_cap // 6)
    can_tile_k = (IN % 128 == 0) and IN > 128

    # tile_n: largest multiple-of-128 DIVISOR of OUT whose fused weight block
    # fits the budget at some legal K tile (lane-dense output => unmasked vst).
    if OUT % 128 == 0:
        tn = 128
        min_k = 128 if can_tile_k else IN
        for cand in range(128, OUT + 1, 128):
            if OUT % cand == 0 and min_k * 2 * cand * itemsize <= w_budget:
                tn = cand
    else:
        tn = OUT  # small / unaligned OUT: single full-width tile

    # tile_k: full IN when it fits, else the largest multiple-of-128 divisor
    # of IN whose (tile_k, 2*tn) weight block fits the budget.
    if not can_tile_k or IN * 2 * tn * itemsize <= w_budget:
        tk = IN
        # TODO(synk): for huge IN that is not a multiple of 128, add a ragged
        # (BoundedSlice) K tile instead of keeping the full-K weight strip.
    else:
        tk = 128
        for cand in range(128, IN + 1, 128):
            if IN % cand == 0 and cand * 2 * tn * itemsize <= w_budget:
                tk = cand
    return tn, tk


def _plan_batch_tile(B, tile_k, tile_n, nj, nk, itemsize, out_itemsize,
                     vmem_cap):
    if B <= 128:
        return B
    tile_b = 128
    for cand in (512, 256):  # prefer large, 256-aligned M tiles (v6e MXU)
        if cand > B:
            continue
        nb = pl.cdiv(B, cand)
        if nb < 2 and nj < 2:
            continue  # keep >=2 "parallel" steps so both v7x TCs get work
        est = _vmem_estimate(cand, tile_k, tile_n, nk, itemsize, out_itemsize,
                             2)
        if est <= int(vmem_cap * 0.6):
            return cand
    return tile_b


# ---------------------------------------------------------------------------
# pallas_call builder
# ---------------------------------------------------------------------------

def _build_call(B, IN, OUT, tile_b, tile_n, tile_k, *, out_dtype,
                compute_dtype, weight_stationary, single_buffer_weights,
                exact_sigmoid, vmem_cap):
    nb = pl.cdiv(B, tile_b)
    nj = OUT // tile_n
    nk = pl.cdiv(IN, tile_k)
    itemsize = jnp.dtype(compute_dtype).itemsize
    out_itemsize = jnp.dtype(out_dtype).itemsize

    w_kwargs = {}
    if single_buffer_weights:
        # Fused weight/bias blocks only change on the OUTER grid axis here;
        # one VMEM copy suffices (halves their footprint; matters on v7x).
        w_kwargs = dict(pipeline_mode=pl.Buffered(1))

    if weight_stationary:
        # (OUT tile, batch tile, K tile): weight block index is independent of
        # the middle (batch) axis -> not re-DMA'd while sweeping the batch.
        grid = (nj, nb, nk)
        x_spec = pl.BlockSpec((tile_b, tile_k), lambda j, bi, k: (bi, k))
        w_spec = pl.BlockSpec((tile_k, 2 * tile_n), lambda j, bi, k: (k, j),
                              **w_kwargs)
        b_spec = pl.BlockSpec((1, 2 * tile_n), lambda j, bi, k: (0, j),
                              **w_kwargs)
        o_spec = pl.BlockSpec((tile_b, tile_n), lambda j, bi, k: (bi, j))
    else:
        # (batch tile, OUT tile, K tile): x block stays resident across the
        # OUT (middle) axis instead.
        grid = (nb, nj, nk)
        x_spec = pl.BlockSpec((tile_b, tile_k), lambda bi, j, k: (bi, k))
        w_spec = pl.BlockSpec((tile_k, 2 * tile_n), lambda bi, j, k: (k, j),
                              **w_kwargs)
        b_spec = pl.BlockSpec((1, 2 * tile_n), lambda bi, j, k: (0, j),
                              **w_kwargs)
        o_spec = pl.BlockSpec((tile_b, tile_n), lambda bi, j, k: (bi, j))

    scratch_shapes = []
    if nk > 1:
        scratch_shapes = [pltpu.VMEM((tile_b, 2 * tile_n), jnp.float32)]

    w_bufs = 1 if single_buffer_weights else 2
    est_vmem = _vmem_estimate(tile_b, tile_k, tile_n, nk, itemsize,
                              out_itemsize, w_bufs)
    vmem_limit = None
    if est_vmem > 16 * 1024 * 1024:  # smallest default scoped limit (v5e)
        # Never request more than ~7/8 of physical VMEM (v7x: 64 MiB per TC).
        vmem_limit = int(min(est_vmem * 3 // 2, vmem_cap * 7 // 8))

    return pl.pallas_call(
        _make_kernel(nk, exact_sigmoid),
        out_shape=jax.ShapeDtypeStruct((B, OUT), out_dtype),
        grid_spec=pltpu.PrefetchScalarGridSpec(
            num_scalar_prefetch=0,
            grid=grid,
            in_specs=[x_spec, w_spec, b_spec],
            out_specs=o_spec,
            scratch_shapes=scratch_shapes,
        ),
        compiler_params=pltpu.CompilerParams(
            dimension_semantics=("parallel", "parallel", "arbitrary"),
            vmem_limit_bytes=vmem_limit,
        ),
    )


# ---------------------------------------------------------------------------
# Public API
# ---------------------------------------------------------------------------

def make_swiglu(w1_t, b1, w2_t, b2, *, compute_dtype=None, out_dtype=None,
                tile_b=None, single_buffer_weights=None):
    """Pack SwiGlu parameters ONCE; return fn(x) = sigmoid(x@w2+b2)*(x@w1+b1).

    w1_t, w2_t : (in_features, out_features)   (transposed nn.Linear weight)
    b1, b2     : (out_features,)
    compute_dtype : matmul dtype.  Pass jnp.bfloat16 in production for ~2x MXU
      throughput and half the weight DMA; accumulation stays f32.  Defaults to
      the weight dtype so f32 parameters keep f32 accuracy.
    """
    IN, OUT = w1_t.shape
    compute_dtype = jnp.dtype(compute_dtype or w1_t.dtype)
    itemsize = compute_dtype.itemsize
    vmem_cap = _vmem_capacity_bytes()

    tile_n, tile_k = _plan_weight_tiles(IN, OUT, itemsize, vmem_cap)
    nj = OUT // tile_n
    nk = pl.cdiv(IN, tile_k)

    # Pack weights/bias once (outside the hot path): each OUT tile j becomes a
    # contiguous, lane-dense [w1_j | w2_j] block of width 2*tile_n.
    w1r = w1_t.reshape(IN, nj, tile_n)
    w2r = w2_t.reshape(IN, nj, tile_n)
    wf = jnp.concatenate([w1r, w2r], axis=2).reshape(IN, nj * 2 * tile_n)
    wf = wf.astype(compute_dtype)
    bf = jnp.concatenate([b1.reshape(nj, tile_n), b2.reshape(nj, tile_n)],
                         axis=1).reshape(1, nj * 2 * tile_n)
    bf = bf.astype(jnp.float32)

    w_block_bytes = tile_k * 2 * tile_n * itemsize

    def fn(x):
        B = x.shape[0]
        odt = jnp.dtype(out_dtype or x.dtype)
        tb = tile_b if tile_b is not None else _plan_batch_tile(
            B, tile_k, tile_n, nj, nk, itemsize, odt.itemsize, vmem_cap)

        # Keep the bigger operand block resident across the inner grid axis.
        weight_stationary = 2 * tile_n >= tb

        # Auto single-buffering: only when weights are inner-grid-invariant
        # (weight-stationary order, no K tiling) and big enough to matter.
        sbw = single_buffer_weights
        if sbw is None:
            sbw = (weight_stationary and nk == 1
                   and w_block_bytes >= 4 * 1024 * 1024)
        sbw = bool(sbw) and _single_buffer_supported()

        call = _build_call(B, IN, OUT, tb, tile_n, tile_k,
                           out_dtype=odt, compute_dtype=compute_dtype,
                           weight_stationary=weight_stationary,
                           single_buffer_weights=sbw,
                           exact_sigmoid=(odt == jnp.float32),
                           vmem_cap=vmem_cap)
        return call(x.astype(compute_dtype), wf, bf)

    return fn


def swiglu(x, w1_t, b1, w2_t, b2, **kwargs):
    """One-shot convenience wrapper.  Prefer make_swiglu(...) so the fused
    weight packing happens once at init time rather than on every call."""
    return make_swiglu(w1_t, b1, w2_t, b2, **kwargs)(x)


# ---------------------------------------------------------------------------
# Demo / self-check
# ---------------------------------------------------------------------------

if __name__ == "__main__":
    # Small shapes consistent with forward(x: (batch, in_features)).
    batch, in_features, out_features = 8, 32, 128

    key = jax.random.PRNGKey(0)
    kx, kw1, kb1, kw2, kb2 = jax.random.split(key, 5)

    x = jax.random.normal(kx, (batch, in_features), dtype=jnp.float32)

    # Deterministic synthetic parameters (PyTorch Linear stores W as (out, in);
    # we keep them transposed as (in, out) for the kernel).
    bound = 1.0 / (in_features ** 0.5)
    w1_t = jax.random.uniform(kw1, (in_features, out_features), jnp.float32,
                              -bound, bound)
    b1 = jax.random.uniform(kb1, (out_features,), jnp.float32, -bound, bound)
    w2_t = jax.random.uniform(kw2, (in_features, out_features), jnp.float32,
                              -bound, bound)
    b2 = jax.random.uniform(kb2, (out_features,), jnp.float32, -bound, bound)

    # Pack once at init time, then apply to activations.
    swiglu_fn = make_swiglu(w1_t, b1, w2_t, b2)
    out = jax.block_until_ready(swiglu_fn(x))

    # Pure-JAX reference (same math as the PyTorch forward).
    h1_ref = x @ w1_t + b1
    ref = jax.nn.sigmoid(x @ w2_t + b2) * h1_ref

    assert out.shape == (batch, out_features)
    assert out.dtype == x.dtype
    assert jnp.allclose(out, ref, atol=1e-3, rtol=1e-3), "mismatch vs reference"

    print("KERNEL_OK")
</pallas_src>

<mosaic_0001>
module attributes {stable_mosaic.version = 11 : i64} {
  func.func @kernel(%arg0: i32, %arg1: i32, %arg2: i32, %arg3: memref<8x32xf32, #tpu.memory_space<vmem>>, %arg4: memref<32x256xf32, #tpu.memory_space<vmem>>, %arg5: memref<1x256xf32, #tpu.memory_space<vmem>>, %arg6: memref<8x128xf32, #tpu.memory_space<vmem>>) attributes {dimension_semantics = [#tpu.dimension_semantics<parallel>, #tpu.dimension_semantics<parallel>, #tpu.dimension_semantics<arbitrary>], iteration_bounds = array<i64: 1, 1, 1>, scalar_prefetch = 0 : i64, scratch_operands = 0 : i64, tpu.core_type = #tpu.core_type<tc>, window_params = [{transform_indices = @transform_0, window_bounds = array<i64: 8, 32>}, {transform_indices = @transform_1, window_bounds = array<i64: 32, 256>}, {transform_indices = @transform_2, window_bounds = array<i64: 1, 256>}, {transform_indices = @transform_3, window_bounds = array<i64: 8, 128>}]} {
    %c0 = arith.constant 0 : index
    %c0_0 = arith.constant 0 : index
    %0 = vector.load %arg3[%c0, %c0_0] : memref<8x32xf32, #tpu.memory_space<vmem>>, vector<8x32xf32>
    %c0_1 = arith.constant 0 : index
    %c0_2 = arith.constant 0 : index
    %1 = vector.load %arg4[%c0_1, %c0_2] : memref<32x256xf32, #tpu.memory_space<vmem>>, vector<32x256xf32>
    %cst = arith.constant dense<0.000000e+00> : vector<8x256xf32>
    %2 = tpu.matmul %0, %1, %cst {dimension_numbers = #tpu.dot_dimension_numbers<[1], [0], [0], [1], [0, 0, 1, 1], [], []>} : vector<8x32xf32>, vector<32x256xf32>, vector<8x256xf32> -> vector<8x256xf32>
    %c0_3 = arith.constant 0 : index
    %c0_4 = arith.constant 0 : index
    %3 = vector.load %arg5[%c0_3, %c0_4] : memref<1x256xf32, #tpu.memory_space<vmem>>, vector<1x256xf32>
    %4 = vector.broadcast %3 : vector<1x256xf32> to vector<8x256xf32>
    %5 = arith.addf %2, %4 : vector<8x256xf32>
    %6 = vector.extract_strided_slice %5 {offsets = [0, 0], sizes = [8, 128], strides = [1, 1]} : vector<8x256xf32> to vector<8x128xf32>
    %7 = vector.extract_strided_slice %5 {offsets = [0, 128], sizes = [8, 128], strides = [1, 1]} : vector<8x256xf32> to vector<8x128xf32>
    %cst_5 = arith.constant 0.000000e+00 : f32
    %8 = vector.broadcast %cst_5 : f32 to vector<8x128xf32>
    %9 = arith.subf %8, %7 : vector<8x128xf32>
    %10 = math.exp %9 : vector<8x128xf32>
    %cst_6 = arith.constant 1.000000e+00 : f32
    %11 = vector.broadcast %cst_6 : f32 to vector<8x128xf32>
    %12 = arith.addf %11, %10 : vector<8x128xf32>
    %cst_7 = arith.constant 1.000000e+00 : f32
    %13 = vector.broadcast %cst_7 : f32 to vector<8x128xf32>
    %14 = arith.divf %13, %12 : vector<8x128xf32>
    %15 = arith.mulf %14, %6 : vector<8x128xf32>
    %c0_8 = arith.constant 0 : index
    %c0_9 = arith.constant 0 : index
    %16 = vector.load %arg6[%c0_8, %c0_9] : memref<8x128xf32, #tpu.memory_space<vmem>>, vector<8x128xf32>
    tpu.vector_store %arg6[%c0_8, %c0_9], %15 {strides = array<i32>} : memref<8x128xf32, #tpu.memory_space<vmem>>, vector<8x128xf32>,
    return
  }
  func.func @transform_0(%arg0: i32, %arg1: i32, %arg2: i32) -> (i32, i32) {
    %c0_i32 = arith.constant 0 : i32
    return %arg1, %arg2 : i32, i32
  }
  func.func @transform_1(%arg0: i32, %arg1: i32, %arg2: i32) -> (i32, i32) {
    %c0_i32 = arith.constant 0 : i32
    return %arg2, %arg0 : i32, i32
  }
  func.func @transform_2(%arg0: i32, %arg1: i32, %arg2: i32) -> (i32, i32) {
    %c0_i32 = arith.constant 0 : i32
    %c0_i32_0 = arith.constant 0 : i32
    return %c0_i32, %arg0 : i32, i32
  }
  func.func @transform_3(%arg0: i32, %arg1: i32, %arg2: i32) -> (i32, i32) {
    %c0_i32 = arith.constant 0 : i32
    return %arg1, %arg0 : i32, i32
  }
}

</mosaic_0001>

<bundles_post_ra>
// kernel: tpu_custom_call.1
= control target key start
LH: loop header
LB: loop body
LE: loop exit
PB: predicated region body
PF: predicated region fallthrough
CT: control target
= control target key end

     0   :  { %8 = vsyncpa [#allocation3], 0  ;;  %s308_s0 = inlined_call_operand.hbm [shape: f32[8,32], index: 0, kind: input, shape index: {}]   ;;  %s309_s1 = inlined_call_operand.hbm [shape: f32[32,256], index: 1, kind: input, shape index: {}]   ;;  %s310_s2 = inlined_call_operand.hbm [shape: f32[1,256], index: 2, kind: input, shape index: {}]   ;;  %s311_s3 = inlined_call_operand.hbm [shape: f32[8,128], index: 3, kind: output, shape index: {}]  }
   0x1   :  { %9 = vsyncpa [#allocation6], 0  ;;  %s26_s14 = sshll.u32 %s309_s1, 4  ;;  %s27_s14 = int_to_ptr.hbm [resolvable:$true] %s26_s14 }
   0x2   :  { %10 = vsyncpa [#allocation4], 0  ;;  %s270_s15 = smov [#allocation5]   ;;  %s16_s19 = sshll.u32 %s308_s0, 4  ;;  %s17_s19 = int_to_ptr.hbm [resolvable:$true] %s16_s19 }
   0x3   :  { %s28_s16 = sshll.u32 %s270_s15, 4  ;;  %s271_s20 = smov 256   ;;  %s29_s16 = int_to_ptr.vmem [resolvable:$true] %s28_s16 }
   0x4   :  { %s272_s21 = smov 16   ;;  %s273_s22 = smov [#allocation2]  }
   0x5   :  { %34 = dma.hbm_to_vmem [thread:$0]  %s27_s14, 1024, %s29_s16, [#allocation6], %s271_s20, %s271_s20, %s272_s21  }
   0x6   :  { %s18_s23 = sshll.u32 %s273_s22, 4  ;;  %s40_s26 = sshll.u32 %s310_s2, 4  ;;  %s19_s23 = int_to_ptr.vmem [resolvable:$true] %s18_s23  ;;  %s41_s26 = int_to_ptr.hbm [resolvable:$true] %s40_s26 }
   0x7   :  { %21 = dma.hbm_to_vmem [thread:$0]  %s17_s19, 128, %s19_s23, [#allocation3]  }
   0x8   :  { %s274_s1 = smov [#allocation7]  }
   0x9   :  { %s42_s27 = sshll.u32 %s274_s1, 4  ;;  %s43_s27 = int_to_ptr.vmem [resolvable:$true] %s42_s27 }
   0xa   :  { %45 = dma.hbm_to_vmem [thread:$0]  %s41_s26, 32, %s43_s27, [#allocation6]  }
   0xb   :  { %264 = dma.done.wait [#allocation3], 128  }
   0xc   :  { %265 = vsyncadd [#allocation3], 4294967168 }
   0xd   :  { %266 = dma.done.wait [#allocation6], 1056  }
   0xe   :  { %267 = vsyncadd [#allocation6], 4294966240  ;;  %v66_v0 = vld [vmem:[#allocation5 + $0x38] sm:$0xff]  ;;  %v64_v1 = vld [vmem:[#allocation5 + $0x28] sm:$0xff]  ;;  %vm73_vm0 = vcmask 261120   ;;  %s275_s0 = smov [#allocation8]  }
   0xf   :  { %109 = vmatpush.msra.mxu1 %v66_v0  ;;  %v65_v2 = vld [vmem:[#allocation5 + $0x30] sm:$0xff]  ;;  %v62_v3 = vld [vmem:[#allocation5 + $0x18] sm:$0xff]  ;;  %v63_v4 = vld [vmem:[#allocation5 + $0x20] sm:$0xff]  ;;  %s143_s2 = sshll.u32 %s275_s0, 4  ;;  %s145_s30 = sshll.u32 %s311_s3, 4  ;;  %s144_s2 = int_to_ptr.vmem [resolvable:$true] %s143_s2  ;;  %s146_s30 = int_to_ptr.hbm [resolvable:$true] %s145_s30 }
  0x10   :  { %89 = vmatpush.msra.mxu0 %v65_v2  ;;  %v61_v5 = vld [vmem:[#allocation5 + $0x10] sm:$0xff]  ;;  %v60_v6 = vld [vmem:[#allocation5 + $0x8] sm:$0xff]  ;;  %v58_v7 = vld [vmem:[#allocation2] sm:$0xff] }
  0x11   :  { %110 = vmatpush.msra.mxu1 %v64_v1  ;;  %v59_v8 = vld [vmem:[#allocation5] sm:$0xff] }
  0x12   :  { %90 = vmatpush.msra.mxu0 %v63_v4  ;;  %v67_v9 = vld [vmem:[#allocation7] sm:$0x3] }
  0x13   :  { %111 = vmatpush.msra.mxu1 %v62_v3  ;;  %v70_v10 = vperm.slane %v67_v9, 1  ;;  %v69_v19 = vperm.slane %v67_v9, 0 }
  0x14   :  { %91 = vmatpush.msra.mxu0 %v61_v5 }
  0x15   :  { %112 = vmatpush.msra.mxu1 %v60_v6 }
  0x16   :  { %157 = vmatmul.msk.f32.vlgmr.msra.gmra.mxu1 %vm73_vm0, %v58_v7  ;;  %92 = vmatpush.msra.mxu0 %v59_v8 }
  0x17   :  { %156 = vmatmul.msk.f32.vlgmr.msra.gmra.mxu0 %vm73_vm0, %v58_v7 }
  0x93   :  { %v114_v11 = vpop.f32.mrf.mxu1 }
  0x94   :  { %v115_v12 = vadd.f32 %v114_v11, %v70_v10  ;;  %v94_v21 = vpop.f32.mrf.mxu0 }
  0x95   :  { %v95_v25 = vadd.f32 %v94_v21, %v69_v19 }
  0x96   :  { %v117_v13 = vsub.f32 0.0, %v115_v12 }
  0x98   :  { %v118_v14 = vmul.f32 1.442695, %v117_v13 }
  0x9a   :  { %164 = vpow2.f32 %v118_v14 }
  0xa0   :  { %v165_v15 = vpop.eup %164 }
  0xa1   :  { %v120_v16 = vadd.f32 1.0, %v165_v15 }
  0xa3   :  { %166 = vrcp.f32 %v120_v16  ;;  %v132_v22 = vand.u32 2147483648, %v120_v16  ;;  %v130_v24 = vand.u32 2147483647, %v120_v16  ;;  %vm126_vm2 = vweird.f32 %v120_v16 }
  0xa5   :  { %v133_v27 = vor.u32 1.1754944e-38, %v132_v22  ;;  %vm131_vm4 = vcmp.eq.f32.partialorder %v130_v24, 8.507059e+37 }
  0xa9   :  { %v167_v17 = vpop.eup %166 }
  0xaa   :  { %v122_v18 = vmul.f32 %v167_v17, %v120_v16  ;;  %vm127_vm1 = vweird.f32 %v167_v17 }
  0xab   :  { %vm128_vm3 = vmor %vm126_vm2, %vm127_vm1 }
  0xac   :  { %v123_v20 = vsub.f32 1.0, %v122_v18 }
  0xae   :  { %v124_v23 = vmul.f32 %v167_v17, %v123_v20 }
  0xb0   :  { %v125_v26 = vadd.f32 %v167_v17, %v124_v23 }
  0xb2   :  { %v129_v28 = vsel %vm128_vm3, %v167_v17, %v125_v26 }
  0xb3   :  { %v134_v29 = vsel %vm131_vm4, %v133_v27, %v129_v28 }
  0xb4   :  { %v136_v30 = vmul.f32 %v134_v29, %v95_v25 }
  0xb6   :  { %137 = vst [vmem:[#allocation8] sm:$0xff] %v136_v30 }
  0xb7   :  { %148 = dma.vmem_to_hbm [thread:$0]  %s144_s2, 128, %s146_s30, [#allocation4]  }
  0xb8   :  { %268 = dma.done.wait [#allocation4], 128  }
  0xb9   :  { %269 = vsyncadd [#allocation4], 4294967168 }
  0xba   :  { %153 = vsyncpa [#allocation3], 1 }
  0xbb   :  { %154 = vsyncpa [#allocation6], 1 }
  0xbc   :  { %155 = vsyncpa [#allocation4], 1 }

</bundles_post_ra>
